<compile_context>
chip_gen: v5e
topology: v5e:2x2
jax: 0.10.0
libtpu: 0.0.40
codegen_flags: <defaults>
</compile_context>

<pallas_src>
import math
import functools

import jax
import jax.numpy as jnp
import numpy as np
from jax.experimental import pallas as pl
from jax.experimental.pallas import tpu as pltpu

# ----------------------------- config (matches the module) ----------------------
PATCH_SIZE = 7
STRIDE = 4
PADDING = PATCH_SIZE // 2       # 3
BN_EPS = 1e-5


def _round_up(x, m):
    return (x + m - 1) // m * m


# ----------------------------- pass 1: stats only (conv + bias -> sum, sumsq) ---
def _stats_kernel(p_ref, w_ref, b_ref, sum_ref, sumsq_ref, *, l_out, tl, needs_mask):
    """p_ref: [TL, CKp]  w_ref: [CKp, Ep]  b_ref: [1, Ep]
       sum_ref/sumsq_ref: [1, Ep] grid-resident f32 accumulators."""
    n = pl.program_id(0)
    i = pl.program_id(1)

    @pl.when(jnp.logical_and(n == 0, i == 0))
    def _():
        sum_ref[...] = jnp.zeros_like(sum_ref)
        sumsq_ref[...] = jnp.zeros_like(sumsq_ref)

    # Conv1d hot path: MXU matmul over the im2col tile, f32 accumulation.
    y = jnp.dot(p_ref[...], w_ref[...], preferred_element_type=jnp.float32)
    y = y + b_ref[...]

    if needs_mask:
        last = pl.num_programs(1) - 1

        @pl.when(i != last)
        def _():
            sum_ref[...] += jnp.sum(y, axis=0, keepdims=True)
            sumsq_ref[...] += jnp.sum(y * y, axis=0, keepdims=True)

        @pl.when(i == last)
        def _():
            # Only the last L tile contains padded rows; exclude them from the stats.
            row = i * tl + jax.lax.broadcasted_iota(jnp.int32, y.shape, 0)
            y_m = jnp.where(row < l_out, y, 0.0)
            sum_ref[...] += jnp.sum(y_m, axis=0, keepdims=True)
            sumsq_ref[...] += jnp.sum(y_m * y_m, axis=0, keepdims=True)
    else:
        sum_ref[...] += jnp.sum(y, axis=0, keepdims=True)
        sumsq_ref[...] += jnp.sum(y * y, axis=0, keepdims=True)


# ----------------------------- pass 2: recompute conv, apply folded BN, transpose
def _conv_bn_kernel(p_ref, w_ref, b_ref, s_ref, ss_ref, g_ref, beta_ref, o_ref, *,
                    inv_m, e_out):
    """p_ref: [TL, CKp]  w_ref: [CKp, Ep]  b/s/ss/g/beta: [1, Ep]  o_ref: [E_out, TL]."""
    y = jnp.dot(p_ref[...], w_ref[...], preferred_element_type=jnp.float32)  # [TL, Ep]

    mean = s_ref[...] * inv_m
    var = jnp.maximum(ss_ref[...] * inv_m - mean * mean, 0.0)   # biased var, training BN
    scale = g_ref[...] * jax.lax.rsqrt(var + BN_EPS)            # EUP op (free slot)
    shift = (b_ref[...] - mean) * scale + beta_ref[...]         # conv bias folded in

    z = y * scale + shift                                       # [TL, Ep]
    zt = z.T                                                    # [Ep, TL] (XLU transpose)
    o_ref[...] = zt[:e_out, :].astype(o_ref.dtype)


# ----------------------------- glue (plain JAX) ----------------------------------
def _im2col_1d(x, kernel_size, stride, padding, out_dtype):
    """x: [N, C, L] -> patches [N, L_out, K*C] in (k, c) column order."""
    N, C, L = x.shape
    L_out = (L + 2 * padding - kernel_size) // stride + 1
    xt = jnp.pad(x, ((0, 0), (0, 0), (padding, padding))).transpose(0, 2, 1)  # [N, Lp, C]
    idx = (jnp.arange(L_out) * stride)[:, None] + jnp.arange(kernel_size)[None, :]
    patches = xt[:, idx, :]                                                   # [N, L_out, K, C]
    return patches.reshape(N, L_out, kernel_size * C).astype(out_dtype), L_out


@functools.partial(jax.jit, static_argnames=("compute_dtype", "tl"))
def overlap_patch_embed(x, weight, bias, gamma, beta, *,
                        compute_dtype=jnp.bfloat16, tl=1024):
    """Forward of OverlapPatchEmbed.

    x:      [N, C_in, L]    (NCL, matching PyTorch Conv1d)
    weight: [E, C_in, K]    (PyTorch Conv1d weight layout)
    bias, gamma, beta: [E]
    returns (out [N, E, L_out] float32, L_out)
    """
    N, C, L = x.shape
    E, _, K = weight.shape

    patches, L_out = _im2col_1d(x, K, STRIDE, PADDING, compute_dtype)  # [N, L_out, K*C]
    M = N * L_out
    CK = K * C

    # TPU-friendly padding: lane-dense E for the matmul, sublane-only E for the
    # transposed output, sublane-aligned contraction, lane-aligned L tiles.
    E_pad = _round_up(E, 128)
    E_out = _round_up(E, 8)
    CK_pad = _round_up(CK, 8)

    TL = _round_up(min(tl, _round_up(L_out, 128)), 128)
    L_out_pad = _round_up(L_out, TL)
    n_tl = L_out_pad // TL

    patches = jnp.pad(patches, ((0, 0), (0, L_out_pad - L_out), (0, CK_pad - CK)))

    # w2d[(k*C + c), e] = weight[e, c, k]  -> matches the patch column order.
    w2d = weight.transpose(2, 1, 0).reshape(CK, E).astype(compute_dtype)
    w2d = jnp.pad(w2d, ((0, CK_pad - CK), (0, E_pad - E)))
    b2d = jnp.pad(bias.reshape(1, E).astype(jnp.float32), ((0, 0), (0, E_pad - E)))
    g2d = jnp.pad(gamma.reshape(1, E).astype(jnp.float32), ((0, 0), (0, E_pad - E)))
    beta2d = jnp.pad(beta.reshape(1, E).astype(jnp.float32), ((0, 0), (0, E_pad - E)))

    itemsize = jnp.dtype(compute_dtype).itemsize

    # ---- pass 1: stats-only (streams patches, writes two [1, E_pad] rows) -------
    kernel1 = functools.partial(_stats_kernel, l_out=L_out, tl=TL,
                                needs_mask=(L_out_pad != L_out))
    s, ss = pl.pallas_call(
        kernel1,
        out_shape=(
            jax.ShapeDtypeStruct((1, E_pad), jnp.float32),
            jax.ShapeDtypeStruct((1, E_pad), jnp.float32),
        ),
        grid_spec=pltpu.PrefetchScalarGridSpec(
            num_scalar_prefetch=0,
            grid=(N, n_tl),
            in_specs=[
                pl.BlockSpec((None, TL, CK_pad), lambda n, i: (n, i, 0)),
                pl.BlockSpec((CK_pad, E_pad), lambda n, i: (0, 0)),
                pl.BlockSpec((1, E_pad), lambda n, i: (0, 0)),
            ],
            out_specs=(
                pl.BlockSpec((1, E_pad), lambda n, i: (0, 0)),   # resident accumulator
                pl.BlockSpec((1, E_pad), lambda n, i: (0, 0)),   # resident accumulator
            ),
        ),
        compiler_params=pltpu.CompilerParams(
            # Stats accumulate across both grid axes -> "arbitrary".
            dimension_semantics=("arbitrary", "arbitrary")),
        cost_estimate=pl.CostEstimate(
            flops=2 * N * L_out_pad * CK_pad * E_pad,
            transcendentals=0,
            bytes_accessed=N * L_out_pad * CK_pad * itemsize
                           + CK_pad * E_pad * itemsize + 2 * E_pad * 4),
    )(patches, w2d, b2d)

    # ---- pass 2: recompute conv, BN folded into scale/shift, transposed output ---
    kernel2 = functools.partial(_conv_bn_kernel, inv_m=1.0 / M, e_out=E_out)
    out = pl.pallas_call(
        kernel2,
        out_shape=jax.ShapeDtypeStruct((N, E_out, L_out_pad), jnp.float32),
        grid_spec=pltpu.PrefetchScalarGridSpec(
            num_scalar_prefetch=0,
            grid=(N, n_tl),
            in_specs=[
                pl.BlockSpec((None, TL, CK_pad), lambda n, i: (n, i, 0)),
                pl.BlockSpec((CK_pad, E_pad), lambda n, i: (0, 0)),
                pl.BlockSpec((1, E_pad), lambda n, i: (0, 0)),
                pl.BlockSpec((1, E_pad), lambda n, i: (0, 0)),
                pl.BlockSpec((1, E_pad), lambda n, i: (0, 0)),
                pl.BlockSpec((1, E_pad), lambda n, i: (0, 0)),
                pl.BlockSpec((1, E_pad), lambda n, i: (0, 0)),
            ],
            out_specs=pl.BlockSpec((None, E_out, TL), lambda n, i: (n, 0, i)),
        ),
        compiler_params=pltpu.CompilerParams(
            dimension_semantics=("parallel", "parallel")),   # independent tiles, megacore OK
        cost_estimate=pl.CostEstimate(
            flops=2 * N * L_out_pad * CK_pad * E_pad,
            transcendentals=N * n_tl * E_pad,
            bytes_accessed=N * L_out_pad * CK_pad * itemsize
                           + CK_pad * E_pad * itemsize
                           + N * E_out * L_out_pad * 4),
    )(patches, w2d, b2d, s, ss, g2d, beta2d)

    # Output is already NCL; only trim channel/length padding (no-op when aligned).
    if (E_out != E) or (L_out_pad != L_out):
        out = out[:, :E, :L_out]
    return out, L_out


# ----------------------------- pure-JAX reference --------------------------------
def _reference(x, weight, bias, gamma, beta):
    y = jax.lax.conv_general_dilated(
        x.astype(jnp.float32), weight.astype(jnp.float32),
        window_strides=(STRIDE,), padding=[(PADDING, PADDING)],
        dimension_numbers=("NCH", "OIH", "NCH"))
    y = y + bias[None, :, None]
    # BatchNorm1d training mode: stats over (N, L), biased variance.
    mean = jnp.mean(y, axis=(0, 2), keepdims=True)
    var = jnp.mean((y - mean) ** 2, axis=(0, 2), keepdims=True)
    y = (y - mean) / jnp.sqrt(var + BN_EPS)
    y = y * gamma[None, :, None] + beta[None, :, None]
    return y, y.shape[-1]


# ----------------------------- main -----------------------------------------------
if __name__ == "__main__":
    # Small shapes consistent with the module: N=2, in_chans=4, L=64, embed_dim=32.
    N, C_IN, L, EMBED = 2, 4, 64, 32

    key = jax.random.PRNGKey(0)
    kx, kw = jax.random.split(key)

    x = jax.random.normal(kx, (N, C_IN, L), dtype=jnp.float32)

    # Deterministic params mirroring the module's _init_weights for Conv1d.
    fan_out = (PATCH_SIZE ** 2) * EMBED // 1
    w_std = math.sqrt(2.0 / fan_out)
    weight = jax.random.normal(kw, (EMBED, C_IN, PATCH_SIZE), dtype=jnp.float32) * w_std
    bias = jnp.zeros((EMBED,), dtype=jnp.float32)
    gamma = jnp.ones((EMBED,), dtype=jnp.float32)    # BatchNorm1d defaults
    beta = jnp.zeros((EMBED,), dtype=jnp.float32)

    ref, hw_ref = _reference(x, weight, bias, gamma, beta)
    ref = jax.block_until_ready(ref)

    # f32 matmul path: tight tolerance against the PyTorch-equivalent reference.
    out_f32, hw_f32 = overlap_patch_embed(x, weight, bias, gamma, beta,
                                          compute_dtype=jnp.float32)
    out_f32 = jax.block_until_ready(out_f32)
    assert int(hw_f32) == int(hw_ref), (hw_f32, hw_ref)
    np.testing.assert_allclose(np.asarray(out_f32), np.asarray(ref), rtol=1e-4, atol=1e-4)

    # Default bf16 matmul path (halves HBM traffic; f32 accumulation + f32 BN stats).
    out_bf, hw_bf = overlap_patch_embed(x, weight, bias, gamma, beta)
    out_bf = jax.block_until_ready(out_bf)
    assert int(hw_bf) == int(hw_ref), (hw_bf, hw_ref)
    np.testing.assert_allclose(np.asarray(out_bf), np.asarray(ref), rtol=5e-2, atol=5e-2)

    print("KERNEL_OK")
</pallas_src>

<mosaic_0001>
module attributes {stable_mosaic.version = 11 : i64} {
  func.func @_stats_kernel(%arg0: i32, %arg1: i32, %arg2: memref<1x128x32xf32, #tpu.memory_space<vmem>>, %arg3: memref<32x128xf32, #tpu.memory_space<vmem>>, %arg4: memref<1x128xf32, #tpu.memory_space<vmem>>, %arg5: memref<1x128xf32, #tpu.memory_space<vmem>>, %arg6: memref<1x128xf32, #tpu.memory_space<vmem>>) attributes {dimension_semantics = [#tpu.dimension_semantics<arbitrary>, #tpu.dimension_semantics<arbitrary>], iteration_bounds = array<i64: 2, 1>, scalar_prefetch = 0 : i64, scratch_operands = 0 : i64, tpu.core_type = #tpu.core_type<tc>, window_params = [{transform_indices = @transform_0, window_bounds = array<i64: 1, 128, 32>}, {pipeline_mode = #tpu.pipeline_mode<synchronous>, transform_indices = @transform_1, window_bounds = array<i64: 32, 128>}, {pipeline_mode = #tpu.pipeline_mode<synchronous>, transform_indices = @transform_2, window_bounds = array<i64: 1, 128>}, {pipeline_mode = #tpu.pipeline_mode<synchronous>, transform_indices = @transform_3, window_bounds = array<i64: 1, 128>}, {pipeline_mode = #tpu.pipeline_mode<synchronous>, transform_indices = @transform_4, window_bounds = array<i64: 1, 128>}]} {
    %c0_i32 = arith.constant 0 : i32
    %0 = arith.cmpi eq, %arg0, %c0_i32 : i32
    %c0_i32_0 = arith.constant 0 : i32
    %1 = arith.cmpi eq, %arg1, %c0_i32_0 : i32
    %2 = arith.andi %0, %1 : i1
    %3 = arith.extui %2 : i1 to i32
    %c0_i32_1 = arith.constant 0 : i32
    %4 = arith.cmpi ne, %3, %c0_i32_1 : i32
    scf.if %4 {
      %cst_12 = arith.constant 0.000000e+00 : f32
      %18 = vector.broadcast %cst_12 : f32 to vector<1x128xf32>
      %c0_13 = arith.constant 0 : index
      %c0_14 = arith.constant 0 : index
      %19 = vector.load %arg5[%c0_13, %c0_14] : memref<1x128xf32, #tpu.memory_space<vmem>>, vector<1x128xf32>
      tpu.vector_store %arg5[%c0_13, %c0_14], %18 {strides = array<i32>} : memref<1x128xf32, #tpu.memory_space<vmem>>, vector<1x128xf32>,
      %cst_15 = arith.constant 0.000000e+00 : f32
      %20 = vector.broadcast %cst_15 : f32 to vector<1x128xf32>
      %c0_16 = arith.constant 0 : index
      %c0_17 = arith.constant 0 : index
      %21 = vector.load %arg6[%c0_16, %c0_17] : memref<1x128xf32, #tpu.memory_space<vmem>>, vector<1x128xf32>
      tpu.vector_store %arg6[%c0_16, %c0_17], %20 {strides = array<i32>} : memref<1x128xf32, #tpu.memory_space<vmem>>, vector<1x128xf32>,
    } else {
    }
    %c0 = arith.constant 0 : index
    %c0_2 = arith.constant 0 : index
    %c0_3 = arith.constant 0 : index
    %5 = vector.load %arg2[%c0, %c0_2, %c0_3] : memref<1x128x32xf32, #tpu.memory_space<vmem>>, vector<1x128x32xf32>
    %6 = vector.shape_cast %5 : vector<1x128x32xf32> to vector<128x32xf32>
    %c0_4 = arith.constant 0 : index
    %c0_5 = arith.constant 0 : index
    %7 = vector.load %arg3[%c0_4, %c0_5] : memref<32x128xf32, #tpu.memory_space<vmem>>, vector<32x128xf32>
    %cst = arith.constant dense<0.000000e+00> : vector<128x128xf32>
    %8 = tpu.matmul %6, %7, %cst {dimension_numbers = #tpu.dot_dimension_numbers<[1], [0], [0], [1], [0, 0, 1, 1], [], []>} : vector<128x32xf32>, vector<32x128xf32>, vector<128x128xf32> -> vector<128x128xf32>
    %c0_6 = arith.constant 0 : index
    %c0_7 = arith.constant 0 : index
    %9 = vector.load %arg4[%c0_6, %c0_7] : memref<1x128xf32, #tpu.memory_space<vmem>>, vector<1x128xf32>
    %10 = vector.broadcast %9 : vector<1x128xf32> to vector<128x128xf32>
    %11 = arith.addf %8, %10 : vector<128x128xf32>
    %c0_i32_8 = arith.constant 0 : i32
    %12 = arith.cmpi ne, %arg1, %c0_i32_8 : i32
    %13 = arith.extui %12 : i1 to i32
    %c0_i32_9 = arith.constant 0 : i32
    %14 = arith.cmpi ne, %13, %c0_i32_9 : i32
    scf.if %14 {
      %c0_12 = arith.constant 0 : index
      %c0_13 = arith.constant 0 : index
      %18 = vector.load %arg5[%c0_12, %c0_13] : memref<1x128xf32, #tpu.memory_space<vmem>>, vector<1x128xf32>
      %cst_14 = arith.constant dense<0.000000e+00> : vector<128xf32>
      %19 = vector.multi_reduction <add>, %11, %cst_14 [0] : vector<128x128xf32> to vector<128xf32>
      %20 = vector.shape_cast %19 : vector<128xf32> to vector<1x128xf32>
      %21 = arith.addf %18, %20 : vector<1x128xf32>
      %c0_15 = arith.constant 0 : index
      %c0_16 = arith.constant 0 : index
      %22 = vector.load %arg5[%c0_15, %c0_16] : memref<1x128xf32, #tpu.memory_space<vmem>>, vector<1x128xf32>
      tpu.vector_store %arg5[%c0_15, %c0_16], %21 {strides = array<i32>} : memref<1x128xf32, #tpu.memory_space<vmem>>, vector<1x128xf32>,
      %c0_17 = arith.constant 0 : index
      %c0_18 = arith.constant 0 : index
      %23 = vector.load %arg6[%c0_17, %c0_18] : memref<1x128xf32, #tpu.memory_space<vmem>>, vector<1x128xf32>
      %24 = arith.mulf %11, %11 : vector<128x128xf32>
      %cst_19 = arith.constant dense<0.000000e+00> : vector<128xf32>
      %25 = vector.multi_reduction <add>, %24, %cst_19 [0] : vector<128x128xf32> to vector<128xf32>
      %26 = vector.shape_cast %25 : vector<128xf32> to vector<1x128xf32>
      %27 = arith.addf %23, %26 : vector<1x128xf32>
      %c0_20 = arith.constant 0 : index
      %c0_21 = arith.constant 0 : index
      %28 = vector.load %arg6[%c0_20, %c0_21] : memref<1x128xf32, #tpu.memory_space<vmem>>, vector<1x128xf32>
      tpu.vector_store %arg6[%c0_20, %c0_21], %27 {strides = array<i32>} : memref<1x128xf32, #tpu.memory_space<vmem>>, vector<1x128xf32>,
    } else {
    }
    %c0_i32_10 = arith.constant 0 : i32
    %15 = arith.cmpi eq, %arg1, %c0_i32_10 : i32
    %16 = arith.extui %15 : i1 to i32
    %c0_i32_11 = arith.constant 0 : i32
    %17 = arith.cmpi ne, %16, %c0_i32_11 : i32
    scf.if %17 {
      %c128_i32 = arith.constant 128 : i32
      %18 = arith.muli %arg1, %c128_i32 : i32
      %19 = tpu.iota {dimensions = array<i32: 0>} : vector<128x128xi32>
      %20 = vector.broadcast %18 : i32 to vector<128x128xi32>
      %21 = arith.addi %20, %19 : vector<128x128xi32>
      %c16_i32 = arith.constant 16 : i32
      %22 = vector.broadcast %c16_i32 : i32 to vector<128x128xi32>
      %23 = arith.cmpi slt, %21, %22 : vector<128x128xi32>
      %cst_12 = arith.constant 0.000000e+00 : f32
      %24 = vector.broadcast %cst_12 : f32 to vector<128x128xf32>
      %25 = arith.select %23, %11, %24 : vector<128x128xi1>, vector<128x128xf32>
      %c0_13 = arith.constant 0 : index
      %c0_14 = arith.constant 0 : index
      %26 = vector.load %arg5[%c0_13, %c0_14] : memref<1x128xf32, #tpu.memory_space<vmem>>, vector<1x128xf32>
      %cst_15 = arith.constant dense<0.000000e+00> : vector<128xf32>
      %27 = vector.multi_reduction <add>, %25, %cst_15 [0] : vector<128x128xf32> to vector<128xf32>
      %28 = vector.shape_cast %27 : vector<128xf32> to vector<1x128xf32>
      %29 = arith.addf %26, %28 : vector<1x128xf32>
      %c0_16 = arith.constant 0 : index
      %c0_17 = arith.constant 0 : index
      %30 = vector.load %arg5[%c0_16, %c0_17] : memref<1x128xf32, #tpu.memory_space<vmem>>, vector<1x128xf32>
      tpu.vector_store %arg5[%c0_16, %c0_17], %29 {strides = array<i32>} : memref<1x128xf32, #tpu.memory_space<vmem>>, vector<1x128xf32>,
      %c0_18 = arith.constant 0 : index
      %c0_19 = arith.constant 0 : index
      %31 = vector.load %arg6[%c0_18, %c0_19] : memref<1x128xf32, #tpu.memory_space<vmem>>, vector<1x128xf32>
      %32 = arith.mulf %25, %25 : vector<128x128xf32>
      %cst_20 = arith.constant dense<0.000000e+00> : vector<128xf32>
      %33 = vector.multi_reduction <add>, %32, %cst_20 [0] : vector<128x128xf32> to vector<128xf32>
      %34 = vector.shape_cast %33 : vector<128xf32> to vector<1x128xf32>
      %35 = arith.addf %31, %34 : vector<1x128xf32>
      %c0_21 = arith.constant 0 : index
      %c0_22 = arith.constant 0 : index
      %36 = vector.load %arg6[%c0_21, %c0_22] : memref<1x128xf32, #tpu.memory_space<vmem>>, vector<1x128xf32>
      tpu.vector_store %arg6[%c0_21, %c0_22], %35 {strides = array<i32>} : memref<1x128xf32, #tpu.memory_space<vmem>>, vector<1x128xf32>,
    } else {
    }
    return
  }
  func.func @transform_0(%arg0: i32, %arg1: i32) -> (i32, i32, i32) {
    %c0_i32 = arith.constant 0 : i32
    %c0_i32_0 = arith.constant 0 : i32
    return %arg0, %arg1, %c0_i32 : i32, i32, i32
  }
  func.func @transform_1(%arg0: i32, %arg1: i32) -> (i32, i32) {
    %c0_i32 = arith.constant 0 : i32
    %c0_i32_0 = arith.constant 0 : i32
    %c0_i32_1 = arith.constant 0 : i32
    return %c0_i32, %c0_i32_0 : i32, i32
  }
  func.func @transform_2(%arg0: i32, %arg1: i32) -> (i32, i32) {
    %c0_i32 = arith.constant 0 : i32
    %c0_i32_0 = arith.constant 0 : i32
    %c0_i32_1 = arith.constant 0 : i32
    return %c0_i32, %c0_i32_0 : i32, i32
  }
  func.func @transform_3(%arg0: i32, %arg1: i32) -> (i32, i32) {
    %c0_i32 = arith.constant 0 : i32
    %c0_i32_0 = arith.constant 0 : i32
    %c0_i32_1 = arith.constant 0 : i32
    return %c0_i32, %c0_i32_0 : i32, i32
  }
  func.func @transform_4(%arg0: i32, %arg1: i32) -> (i32, i32) {
    %c0_i32 = arith.constant 0 : i32
    %c0_i32_0 = arith.constant 0 : i32
    %c0_i32_1 = arith.constant 0 : i32
    return %c0_i32, %c0_i32_0 : i32, i32
  }
}

module attributes {stable_mosaic.version = 11 : i64} {
  func.func @_conv_bn_kernel(%arg0: i32, %arg1: i32, %arg2: memref<1x128x32xf32, #tpu.memory_space<vmem>>, %arg3: memref<32x128xf32, #tpu.memory_space<vmem>>, %arg4: memref<1x128xf32, #tpu.memory_space<vmem>>, %arg5: memref<1x128xf32, #tpu.memory_space<vmem>>, %arg6: memref<1x128xf32, #tpu.memory_space<vmem>>, %arg7: memref<1x128xf32, #tpu.memory_space<vmem>>, %arg8: memref<1x128xf32, #tpu.memory_space<vmem>>, %arg9: memref<1x32x128xf32, #tpu.memory_space<vmem>>) attributes {dimension_semantics = [#tpu.dimension_semantics<parallel>, #tpu.dimension_semantics<parallel>], iteration_bounds = array<i64: 2, 1>, scalar_prefetch = 0 : i64, scratch_operands = 0 : i64, tpu.core_type = #tpu.core_type<tc>, window_params = [{transform_indices = @transform_0, window_bounds = array<i64: 1, 128, 32>}, {pipeline_mode = #tpu.pipeline_mode<synchronous>, transform_indices = @transform_1, window_bounds = array<i64: 32, 128>}, {pipeline_mode = #tpu.pipeline_mode<synchronous>, transform_indices = @transform_2, window_bounds = array<i64: 1, 128>}, {pipeline_mode = #tpu.pipeline_mode<synchronous>, transform_indices = @transform_3, window_bounds = array<i64: 1, 128>}, {pipeline_mode = #tpu.pipeline_mode<synchronous>, transform_indices = @transform_4, window_bounds = array<i64: 1, 128>}, {pipeline_mode = #tpu.pipeline_mode<synchronous>, transform_indices = @transform_5, window_bounds = array<i64: 1, 128>}, {pipeline_mode = #tpu.pipeline_mode<synchronous>, transform_indices = @transform_6, window_bounds = array<i64: 1, 128>}, {transform_indices = @transform_7, window_bounds = array<i64: 1, 32, 128>}]} {
    %c0 = arith.constant 0 : index
    %c0_0 = arith.constant 0 : index
    %c0_1 = arith.constant 0 : index
    %0 = vector.load %arg2[%c0, %c0_0, %c0_1] : memref<1x128x32xf32, #tpu.memory_space<vmem>>, vector<1x128x32xf32>
    %1 = vector.shape_cast %0 : vector<1x128x32xf32> to vector<128x32xf32>
    %c0_2 = arith.constant 0 : index
    %c0_3 = arith.constant 0 : index
    %2 = vector.load %arg3[%c0_2, %c0_3] : memref<32x128xf32, #tpu.memory_space<vmem>>, vector<32x128xf32>
    %cst = arith.constant dense<0.000000e+00> : vector<128x128xf32>
    %3 = tpu.matmul %1, %2, %cst {dimension_numbers = #tpu.dot_dimension_numbers<[1], [0], [0], [1], [0, 0, 1, 1], [], []>} : vector<128x32xf32>, vector<32x128xf32>, vector<128x128xf32> -> vector<128x128xf32>
    %c0_4 = arith.constant 0 : index
    %c0_5 = arith.constant 0 : index
    %4 = vector.load %arg5[%c0_4, %c0_5] : memref<1x128xf32, #tpu.memory_space<vmem>>, vector<1x128xf32>
    %cst_6 = arith.constant 3.125000e-02 : f32
    %5 = vector.broadcast %cst_6 : f32 to vector<1x128xf32>
    %6 = arith.mulf %4, %5 : vector<1x128xf32>
    %c0_7 = arith.constant 0 : index
    %c0_8 = arith.constant 0 : index
    %7 = vector.load %arg6[%c0_7, %c0_8] : memref<1x128xf32, #tpu.memory_space<vmem>>, vector<1x128xf32>
    %cst_9 = arith.constant 3.125000e-02 : f32
    %8 = vector.broadcast %cst_9 : f32 to vector<1x128xf32>
    %9 = arith.mulf %7, %8 : vector<1x128xf32>
    %10 = arith.mulf %6, %6 : vector<1x128xf32>
    %11 = arith.subf %9, %10 : vector<1x128xf32>
    %cst_10 = arith.constant 0.000000e+00 : f32
    %12 = vector.broadcast %cst_10 : f32 to vector<1x128xf32>
    %13 = arith.maximumf %11, %12 : vector<1x128xf32>
    %c0_11 = arith.constant 0 : index
    %c0_12 = arith.constant 0 : index
    %14 = vector.load %arg7[%c0_11, %c0_12] : memref<1x128xf32, #tpu.memory_space<vmem>>, vector<1x128xf32>
    %cst_13 = arith.constant 9.99999974E-6 : f32
    %15 = vector.broadcast %cst_13 : f32 to vector<1x128xf32>
    %16 = arith.addf %13, %15 : vector<1x128xf32>
    %17 = math.rsqrt %16 : vector<1x128xf32>
    %18 = arith.mulf %14, %17 : vector<1x128xf32>
    %c0_14 = arith.constant 0 : index
    %c0_15 = arith.constant 0 : index
    %19 = vector.load %arg4[%c0_14, %c0_15] : memref<1x128xf32, #tpu.memory_space<vmem>>, vector<1x128xf32>
    %20 = arith.subf %19, %6 : vector<1x128xf32>
    %21 = arith.mulf %20, %18 : vector<1x128xf32>
    %c0_16 = arith.constant 0 : index
    %c0_17 = arith.constant 0 : index
    %22 = vector.load %arg8[%c0_16, %c0_17] : memref<1x128xf32, #tpu.memory_space<vmem>>, vector<1x128xf32>
    %23 = arith.addf %21, %22 : vector<1x128xf32>
    %24 = vector.broadcast %18 : vector<1x128xf32> to vector<128x128xf32>
    %25 = arith.mulf %3, %24 : vector<128x128xf32>
    %26 = vector.broadcast %23 : vector<1x128xf32> to vector<128x128xf32>
    %27 = arith.addf %25, %26 : vector<128x128xf32>
    %28 = tpu.transpose %27, [1, 0] : vector<128x128xf32> -> vector<128x128xf32>
    %29 = vector.extract_strided_slice %28 {offsets = [0, 0], sizes = [32, 128], strides = [1, 1]} : vector<128x128xf32> to vector<32x128xf32>
    %c0_18 = arith.constant 0 : index
    %c0_19 = arith.constant 0 : index
    %c0_20 = arith.constant 0 : index
    %30 = vector.load %arg9[%c0_18, %c0_19, %c0_20] : memref<1x32x128xf32, #tpu.memory_space<vmem>>, vector<1x32x128xf32>
    %31 = vector.shape_cast %30 : vector<1x32x128xf32> to vector<32x128xf32>
    %32 = vector.shape_cast %29 : vector<32x128xf32> to vector<1x32x128xf32>
    tpu.vector_store %arg9[%c0_18, %c0_19, %c0_20], %32 {strides = array<i32>} : memref<1x32x128xf32, #tpu.memory_space<vmem>>, vector<1x32x128xf32>,
    return
  }
  func.func @transform_0(%arg0: i32, %arg1: i32) -> (i32, i32, i32) {
    %c0_i32 = arith.constant 0 : i32
    %c0_i32_0 = arith.constant 0 : i32
    return %arg0, %arg1, %c0_i32 : i32, i32, i32
  }
  func.func @transform_1(%arg0: i32, %arg1: i32) -> (i32, i32) {
    %c0_i32 = arith.constant 0 : i32
    %c0_i32_0 = arith.constant 0 : i32
    %c0_i32_1 = arith.constant 0 : i32
    return %c0_i32, %c0_i32_0 : i32, i32
  }
  func.func @transform_2(%arg0: i32, %arg1: i32) -> (i32, i32) {
    %c0_i32 = arith.constant 0 : i32
    %c0_i32_0 = arith.constant 0 : i32
    %c0_i32_1 = arith.constant 0 : i32
    return %c0_i32, %c0_i32_0 : i32, i32
  }
  func.func @transform_3(%arg0: i32, %arg1: i32) -> (i32, i32) {
    %c0_i32 = arith.constant 0 : i32
    %c0_i32_0 = arith.constant 0 : i32
    %c0_i32_1 = arith.constant 0 : i32
    return %c0_i32, %c0_i32_0 : i32, i32
  }
  func.func @transform_4(%arg0: i32, %arg1: i32) -> (i32, i32) {
    %c0_i32 = arith.constant 0 : i32
    %c0_i32_0 = arith.constant 0 : i32
    %c0_i32_1 = arith.constant 0 : i32
    return %c0_i32, %c0_i32_0 : i32, i32
  }
  func.func @transform_5(%arg0: i32, %arg1: i32) -> (i32, i32) {
    %c0_i32 = arith.constant 0 : i32
    %c0_i32_0 = arith.constant 0 : i32
    %c0_i32_1 = arith.constant 0 : i32
    return %c0_i32, %c0_i32_0 : i32, i32
  }
  func.func @transform_6(%arg0: i32, %arg1: i32) -> (i32, i32) {
    %c0_i32 = arith.constant 0 : i32
    %c0_i32_0 = arith.constant 0 : i32
    %c0_i32_1 = arith.constant 0 : i32
    return %c0_i32, %c0_i32_0 : i32, i32
  }
  func.func @transform_7(%arg0: i32, %arg1: i32) -> (i32, i32, i32) {
    %c0_i32 = arith.constant 0 : i32
    %c0_i32_0 = arith.constant 0 : i32
    return %arg0, %c0_i32, %arg1 : i32, i32, i32
  }
}

</mosaic_0001>

<bundles_post_ra>
// kernel: overlap_patch_embed.3
= control target key start
LH: loop header
LB: loop body
LE: loop exit
PB: predicated region body
PF: predicated region fallthrough
CT: control target
= control target key end

     0   :  { %s762_s24 = smov 0   ;;  %s764_s25 = smov 0   ;;  %s896_s0 = inlined_call_operand.vmem [shape: f32[2,128,32], index: 0, kind: input, shape index: {}]   ;;  %s897_s1 = inlined_call_operand.vmem [shape: f32[32,128], index: 1, kind: input, shape index: {}]   ;;  %s898_s2 = inlined_call_operand.vmem [shape: f32[1,128], index: 2, kind: input, shape index: {}]   ;;  %s899_s3 = inlined_call_operand.vmem [shape: f32[1,128], index: 3, kind: input, shape index: {}]   ;;  %s900_s4 = inlined_call_operand.vmem [shape: f32[1,128], index: 4, kind: input, shape index: {}]   ;;  %s901_s5 = inlined_call_operand.vmem [shape: f32[1,128], index: 5, kind: input, shape index: {}]   ;;  %s902_s6 = inlined_call_operand.vmem [shape: f32[1,128], index: 6, kind: input, shape index: {}]   ;;  %s903_s7 = inlined_call_operand.vmem [shape: f32[2,32,128], index: 7, kind: output, shape index: {}]  }
   0x1   :  { %s766_s26 = smov 0  }
   0x2 LB: > { %s29_s27 = sadd.s32 1, %s716_s25  ;;  %p635_p0 = scmp.ge.s32.totalorder %s720_s26, 1  ;;  %s720_s26 = sphi %s766_s26, %s17_s26   ;;  %s716_s25 = sphi %s764_s25, %s905_s25   ;;  %s712_s24 = sphi %s762_s24, %s904_s24  }
   0x3   : > { %p31_p1 = scmp.ge.s32.totalorder %s29_s27, 2  ;;  %p258_p2 = scmp.lt.s32.totalorder %s720_s26, 3 }
   0x5   : > { %s907_s27 = smov (%p31_p1, %s29_s27), 0  ;;  %p259_p3 = pnand %p635_p0, %p258_p2 }
   0x6   : > { %p298_p4 = scmp.lt.s32.totalorder (!%p259_p3), %s712_s24, 1 }
   0x7   : > { %262 = sbr.rel (%p259_p3) target bundleno = 340 (0x154), region = 48 }
   0xc   : > { %v334_v0 = vld [vmem:[%s897_s1 + $0x18] sm:$0xff]  ;;  %v333_v1 = vld [vmem:[%s897_s1 + $0x10] sm:$0xff]  ;;  %v332_v2 = vld [vmem:[%s897_s1 + $0x8] sm:$0xff]  ;;  %s909_s24 = smov (!%p298_p4, %s712_s24), 1  ;;  %vm335_vm0 = vcmask 261120  }
   0xd   : > { %396 = vmatpush.msra.mxu0 %v334_v0  ;;  %660 = vmatpush.msra.mxu1 %v334_v0  ;;  %v331_v3 = vld [vmem:[%s897_s1] sm:$0xff]  ;;  %s658_s13 = sshll.u32 %s909_s24, 7  ;;  %s659_s8 = sshll.u32 %s909_s24, 5 }
   0xe   : > { %661 = vmatpush.msra.mxu2 %v334_v0  ;;  %662 = vmatpush.msra.mxu3 %v334_v0  ;;  %s798_s16 = scalar_lea.vmem %s896_s0, %s658_s13  ;;  %v449_v20 = vld [vmem:[%s899_s3] sm:$0x1]  ;;  %s314_s11 = scalar_lea.vmem %s903_s7, %s659_s8 }
   0xf   : > { %397 = vmatpush.msra.mxu0 %v333_v1  ;;  %663 = vmatpush.msra.mxu1 %v333_v1  ;;  %v315_v4 = vld [vmem:[%s798_s16] sm:$0xff]  ;;  %v316_v8 = vld [vmem:[%s798_s16 + $0x8] sm:$0xff]  ;;  %v317_v12 = vld [vmem:[%s798_s16 + $0x10] sm:$0xff]  ;;  %v450_v21 = vmul.f32 0.03125, %v449_v20 }
  0x10   : > { %664 = vmatpush.msra.mxu2 %v333_v1  ;;  %665 = vmatpush.msra.mxu3 %v333_v1  ;;  %v319_v5 = vld [vmem:[%s798_s16 + $0x20] sm:$0xff]  ;;  %v320_v9 = vld [vmem:[%s798_s16 + $0x28] sm:$0xff]  ;;  %v321_v13 = vld [vmem:[%s798_s16 + $0x30] sm:$0xff] }
  0x11   : > { %398 = vmatpush.msra.mxu0 %v332_v2  ;;  %666 = vmatpush.msra.mxu1 %v332_v2  ;;  %v323_v6 = vld [vmem:[%s798_s16 + $0x40] sm:$0xff]  ;;  %v324_v10 = vld [vmem:[%s798_s16 + $0x48] sm:$0xff]  ;;  %v325_v14 = vld [vmem:[%s798_s16 + $0x50] sm:$0xff]  ;;  %v453_v24 = vmul.f32 %v450_v21, %v450_v21 }
  0x12   : > { %667 = vmatpush.msra.mxu2 %v332_v2  ;;  %668 = vmatpush.msra.mxu3 %v332_v2  ;;  %v327_v7 = vld [vmem:[%s798_s16 + $0x60] sm:$0xff]  ;;  %v328_v11 = vld [vmem:[%s798_s16 + $0x68] sm:$0xff]  ;;  %v329_v15 = vld [vmem:[%s798_s16 + $0x70] sm:$0xff] }
  0x13   : > { %399 = vmatpush.msra.mxu0 %v331_v3  ;;  %669 = vmatpush.msra.mxu1 %v331_v3  ;;  %v318_v16 = vld [vmem:[%s798_s16 + $0x18] sm:$0xff]  ;;  %v451_v22 = vld [vmem:[%s900_s4] sm:$0x1] }
  0x14   : > { %640 = vmatmul.msk.f32.vlgmr.msra.gmra.mxu0 %vm335_vm0, %v315_v4  ;;  %644 = vmatmul.msk.f32.vlgmr.msra.gmra.mxu1 %vm335_vm0, %v319_v5  ;;  %v322_v17 = vld [vmem:[%s798_s16 + $0x38] sm:$0xff]  ;;  %v452_v23 = vmul.f32 0.03125, %v451_v22  ;;  %v456_v34 = vld [vmem:[%s901_s5] sm:$0x1] }
  0x15   : > { %670 = vmatpush.msra.mxu2 %v331_v3  ;;  %671 = vmatpush.msra.mxu3 %v331_v3  ;;  %v326_v18 = vld [vmem:[%s798_s16 + $0x58] sm:$0xff]  ;;  %v469_v36 = vld [vmem:[%s898_s2] sm:$0x1] }
  0x16   : > { %648 = vmatmul.msk.f32.vlgmr.msra.gmra.mxu2 %vm335_vm0, %v323_v6  ;;  %652 = vmatmul.msk.f32.vlgmr.msra.gmra.mxu3 %vm335_vm0, %v327_v7  ;;  %v330_v19 = vld [vmem:[%s798_s16 + $0x78] sm:$0xff]  ;;  %v454_v25 = vsub.f32 %v452_v23, %v453_v24  ;;  %v470_v38 = vsub.f32 %v469_v36, %v450_v21  ;;  %v472_v40 = vld [vmem:[%s902_s6] sm:$0x1] }
  0x18   : > { %v455_v26 = vmax.f32 %v454_v25, 0.0 }
  0x1a   : > { %v457_v27 = vadd.f32 1e-05, %v455_v26 }
  0x1c   : > { %641 = vmatmul.msk.f32.gmra.mxu0 %vm335_vm0, %v316_v8  ;;  %645 = vmatmul.msk.f32.gmra.mxu1 %vm335_vm0, %v320_v9  ;;  %696 = vrsqrt.f32 %v457_v27  ;;  %vm464_vm1 = vweird.f32 %v457_v27 }
  0x1e   : > { %649 = vmatmul.msk.f32.gmra.mxu2 %vm335_vm0, %v324_v10  ;;  %653 = vmatmul.msk.f32.gmra.mxu3 %vm335_vm0, %v328_v11 }
  0x22   : > { %v697_v28 = vpop.eup %696 }
  0x23   : > { %v459_v29 = vmul.f32 %v697_v28, %v457_v27  ;;  %vm465_vm2 = vweird.f32 %v697_v28 }
  0x24   : > { %642 = vmatmul.msk.f32.gmra.mxu0 %vm335_vm0, %v317_v12  ;;  %646 = vmatmul.msk.f32.gmra.mxu1 %vm335_vm0, %v321_v13  ;;  %vm466_vm3 = vmor %vm464_vm1, %vm465_vm2 }
  0x25   : > { %v460_v30 = vmul.f32 %v697_v28, %v459_v29 }
  0x26   : > { %650 = vmatmul.msk.f32.gmra.mxu2 %vm335_vm0, %v325_v14  ;;  %654 = vmatmul.msk.f32.gmra.mxu3 %vm335_vm0, %v329_v15 }
  0x27   : > { %v461_v31 = vmul.f32 0.5, %v460_v30 }
  0x29   : > { %v462_v32 = vsub.f32 1.5, %v461_v31 }
  0x2b   : > { %v463_v33 = vmul.f32 %v697_v28, %v462_v32 }
  0x2c   : > { %643 = vmatmul.msk.f32.gmra.mxu0 %vm335_vm0, %v318_v16  ;;  %647 = vmatmul.msk.f32.gmra.mxu1 %vm335_vm0, %v322_v17 }
  0x2d   : > { %v467_v35 = vsel %vm466_vm3, %v697_v28, %v463_v33 }
  0x2e   : > { %651 = vmatmul.msk.f32.gmra.mxu2 %vm335_vm0, %v326_v18  ;;  %655 = vmatmul.msk.f32.gmra.mxu3 %vm335_vm0, %v330_v19  ;;  %v468_v37 = vmul.f32 %v467_v35, %v456_v34 }
  0x30   : > { %v471_v39 = vmul.f32 %v470_v38, %v468_v37  ;;  %v847_v42 = vperm.slane %v468_v37, 0 }
  0x32   : > { %v473_v41 = vadd.f32 %v472_v40, %v471_v39 }
  0x34   : > { %v849_v43 = vperm.slane %v473_v41, 0 }
  0x91   : > { %v401_v44 = vpop.f32.mrf.mxu0  ;;  %v413_v53 = vpop.f32.mrf.mxu1 }
  0x92   : > { %v477_v45 = vmul.f32 %v847_v42, %v401_v44  ;;  %v481_v57 = vmul.f32 %v847_v42, %v413_v53 }
  0x94   : > { %v496_v46 = vadd.f32 %v849_v43, %v477_v45  ;;  %v500_v59 = vadd.f32 %v849_v43, %v481_v57 }
  0x96   : > { %512 = vxpose.xlu0.b32.start [1/16] (narrow) %v496_v46, 32 }
  0x99   : > { %v404_v47 = vpop.f32.mrf.mxu0  ;;  %v416_v58 = vpop.f32.mrf.mxu1 }
  0x9a   : > { %v478_v48 = vmul.f32 %v847_v42, %v404_v47  ;;  %v482_v60 = vmul.f32 %v847_v42, %v416_v58  ;;  %v425_v2 = vpop.f32.mrf.mxu2  ;;  %v437_v14 = vpop.f32.mrf.mxu3 }
  0x9b   : > { %v485_v5 = vmul.f32 %v847_v42, %v425_v2  ;;  %v489_v17 = vmul.f32 %v847_v42, %v437_v14 }
  0x9c   : > { %v497_v49 = vadd.f32 %v849_v43, %v478_v48  ;;  %v501_v62 = vadd.f32 %v849_v43, %v482_v60 }
  0x9d   : > { %v504_v7 = vadd.f32 %v849_v43, %v485_v5  ;;  %v508_v19 = vadd.f32 %v849_v43, %v489_v17 }
  0x9e   : > { %513 = vxpose.xlu0.b32.cont [2/16] (narrow) %v497_v49, 32 }
  0xa1   : > { %v407_v50 = vpop.f32.mrf.mxu0  ;;  %v419_v61 = vpop.f32.mrf.mxu1 }
  0xa2   : > { %v479_v51 = vmul.f32 %v847_v42, %v407_v50  ;;  %v483_v63 = vmul.f32 %v847_v42, %v419_v61  ;;  %v428_v6 = vpop.f32.mrf.mxu2  ;;  %v440_v18 = vpop.f32.mrf.mxu3 }
  0xa3   : > { %v486_v8 = vmul.f32 %v847_v42, %v428_v6  ;;  %v490_v20 = vmul.f32 %v847_v42, %v440_v18 }
  0xa4   : > { %v498_v52 = vadd.f32 %v849_v43, %v479_v51  ;;  %v502_v0 = vadd.f32 %v849_v43, %v483_v63 }
  0xa5   : > { %v505_v10 = vadd.f32 %v849_v43, %v486_v8  ;;  %v509_v22 = vadd.f32 %v849_v43, %v490_v20 }
  0xa6   : > { %514 = vxpose.xlu0.b32.cont [3/16] (narrow) %v498_v52, 32 }
  0xa9   : > { %v410_v54 = vpop.f32.mrf.mxu0  ;;  %v422_v1 = vpop.f32.mrf.mxu1 }
  0xaa   : > { %v480_v55 = vmul.f32 %v847_v42, %v410_v54  ;;  %v484_v3 = vmul.f32 %v847_v42, %v422_v1  ;;  %v431_v9 = vpop.f32.mrf.mxu2  ;;  %v443_v21 = vpop.f32.mrf.mxu3 }
  0xab   : > { %v487_v11 = vmul.f32 %v847_v42, %v431_v9  ;;  %v491_v23 = vmul.f32 %v847_v42, %v443_v21 }
  0xac   : > { %v499_v56 = vadd.f32 %v849_v43, %v480_v55  ;;  %v503_v4 = vadd.f32 %v849_v43, %v484_v3 }
  0xad   : > { %v506_v12 = vadd.f32 %v849_v43, %v487_v11  ;;  %v510_v24 = vadd.f32 %v849_v43, %v491_v23 }
  0xae   : > { %515 = vxpose.xlu0.b32.cont [4/16] (narrow) %v499_v56, 32 }
  0xb2   : > { %v434_v13 = vpop.f32.mrf.mxu2  ;;  %v446_v25 = vpop.f32.mrf.mxu3 }
  0xb3   : > { %v488_v15 = vmul.f32 %v847_v42, %v434_v13  ;;  %v492_v26 = vmul.f32 %v847_v42, %v446_v25 }
  0xb5   : > { %v507_v16 = vadd.f32 %v849_v43, %v488_v15  ;;  %v511_v27 = vadd.f32 %v849_v43, %v492_v26 }
  0xb6   : > { %516 = vxpose.xlu0.b32.cont [5/16] (narrow) %v500_v59, 32 }
  0xbe   : > { %517 = vxpose.xlu0.b32.cont [6/16] (narrow) %v501_v62, 32 }
  0xc6   : > { %518 = vxpose.xlu0.b32.cont [7/16] (narrow) %v502_v0, 32 }
  0xce   : > { %519 = vxpose.xlu0.b32.cont [8/16] (narrow) %v503_v4, 32 }
  0xd6   : > { %520 = vxpose.xlu0.b32.cont [9/16] (narrow) %v504_v7, 32 }
  0xde   : > { %521 = vxpose.xlu0.b32.cont [10/16] (narrow) %v505_v10, 32 }
  0xe6   : > { %522 = vxpose.xlu0.b32.cont [11/16] (narrow) %v506_v12, 32 }
  0xee   : > { %523 = vxpose.xlu0.b32.cont [12/16] (narrow) %v507_v16, 32 }
  0xf6   : > { %524 = vxpose.xlu0.b32.cont [13/16] (narrow) %v508_v19, 32 }
  0xfe   : > { %525 = vxpose.xlu0.b32.cont [14/16] (narrow) %v509_v22, 32 }
 0x106   : > { %526 = vxpose.xlu0.b32.cont [15/16] (narrow) %v510_v24, 32 }
 0x10e   : > { %527 = vxpose.xlu0.b32.end [16/16] (narrow) %v511_v27, 32 }
 0x13a   : > { %v528_v28 = vpop.trf.xlu0 }
 0x13b   : > { %544 = vst [vmem:[%s314_s11] sm:$0xff] %v528_v28 }
 0x142   : > { %v529_v29 = vpop.trf.xlu0 }
 0x143   : > { %545 = vst [vmem:[%s314_s11 + $0x8] sm:$0xff] %v529_v29 }
 0x14a   : > { %v530_v30 = vpop.trf.xlu0 }
 0x14b   : > { %546 = vst [vmem:[%s314_s11 + $0x10] sm:$0xff] %v530_v30 }
 0x152   : > { %v531_v31 = vpop.trf.xlu0 }
 0x153   : > { %547 = vst [vmem:[%s314_s11 + $0x18] sm:$0xff] %v531_v31 }
 0x154 PF: > { %s17_s26 = sadd.s32 1, %s720_s26   ;;  %s904_s24 = smov %s716_s25 }
 0x155   : > { %p14_p5 = scmp.ge.s32.totalorder %s17_s26, 4   ;;  %s905_s25 = smov %s907_s27 }
 0x157   :  { %16 = sbr.rel (!%p14_p5) target bundleno = 2 (0x2), region = 78 }

// kernel: overlap_patch_embed.2
= control target key start
LH: loop header
LB: loop body
LE: loop exit
PB: predicated region body
PF: predicated region fallthrough
CT: control target
= control target key end

     0   :  { %s720_s15 = smov 0   ;;  %s722_s16 = smov 0   ;;  %s817_s0 = inlined_call_operand.vmem [shape: f32[2,128,32], index: 0, kind: input, shape index: {}]   ;;  %s818_s1 = inlined_call_operand.vmem [shape: f32[32,128], index: 1, kind: input, shape index: {}]   ;;  %s819_s2 = inlined_call_operand.vmem [shape: f32[1,128], index: 2, kind: input, shape index: {}]   ;;  %s820_s3 = inlined_call_operand.vmem [shape: f32[1,128], index: 3, kind: output, shape index: {0}]   ;;  %s821_s4 = inlined_call_operand.vmem [shape: f32[1,128], index: 4, kind: output, shape index: {1}]  }
   0x1   :  { %s724_s17 = smov 0  }
   0x2 LB: > { %s27_s18 = sadd.s32 1, %s688_s16  ;;  %p608_p0 = scmp.ge.s32.totalorder %s692_s17, 1  ;;  %s692_s17 = sphi %s724_s17, %s15_s17   ;;  %s688_s16 = sphi %s722_s16, %s823_s16   ;;  %s684_s15 = sphi %s720_s15, %s822_s15  }
   0x3   : > { %p29_p1 = scmp.ge.s32.totalorder %s27_s18, 2  ;;  %p174_p2 = scmp.lt.s32.totalorder %s692_s17, 3 }
   0x5   : > { %s825_s18 = smov (%p29_p1, %s27_s18), 0  ;;  %p175_p3 = pnand %p608_p0, %p174_p2 }
   0x6   : > { %p200_p4 = scmp.lt.s32.totalorder (!%p175_p3), %s684_s15, 1  ;;  %p209_p5 = scmp.eq.s32.totalorder (!%p175_p3), %s684_s15, 0 }
   0x7   : > { %178 = sbr.rel (%p175_p3) target bundleno = 182 (0xb6), region = 32 }
   0xc   : > { %s827_s15 = smov (!%p200_p4, %s684_s15), 1  ;;  %214 = sbr.rel (!%p209_p5) target bundleno = 17 (0x11), region = 36  ;;  %v694_v0 = vmov (%p209_p5), 0.0  }
   0xd   : > { %s630_s19 = sshll.u32 %s827_s15, 7  ;;  %215 = vst [vmem:[%s820_s3] sm:$0x1] (%p209_p5), %v694_v0 }
   0xe   : > { %s741_s22 = scalar_lea.vmem %s817_s0, %s630_s19  ;;  %216 = vst [vmem:[%s821_s4] sm:$0x1] (%p209_p5), %v694_v0 }
  0x11 PF: > { %v236_v1 = vld [vmem:[%s818_s1 + $0x18] sm:$0xff]  ;;  %v235_v2 = vld [vmem:[%s818_s1 + $0x10] sm:$0xff]  ;;  %v234_v3 = vld [vmem:[%s818_s1 + $0x8] sm:$0xff]  ;;  %vm241_vm0 = vcmask 261120  }
  0x12   : > { %302 = vmatpush.msra.mxu0 %v236_v1  ;;  %633 = vmatpush.msra.mxu2 %v236_v1  ;;  %v233_v4 = vld [vmem:[%s818_s1] sm:$0xff]  ;;  %v218_v9 = vld [vmem:[%s741_s22 + $0x8] sm:$0xff]  ;;  %v219_v13 = vld [vmem:[%s741_s22 + $0x10] sm:$0xff] }
  0x13   : > { %634 = vmatpush.msra.mxu3 %v236_v1  ;;  %632 = vmatpush.msra.mxu1 %v236_v1  ;;  %v217_v5 = vld [vmem:[%s741_s22] sm:$0xff]  ;;  %v226_v10 = vld [vmem:[%s741_s22 + $0x48] sm:$0xff]  ;;  %v227_v14 = vld [vmem:[%s741_s22 + $0x50] sm:$0xff] }
  0x14   : > { %303 = vmatpush.msra.mxu0 %v235_v2  ;;  %636 = vmatpush.msra.mxu2 %v235_v2  ;;  %v225_v6 = vld [vmem:[%s741_s22 + $0x40] sm:$0xff]  ;;  %v230_v11 = vld [vmem:[%s741_s22 + $0x68] sm:$0xff]  ;;  %v231_v15 = vld [vmem:[%s741_s22 + $0x70] sm:$0xff] }
  0x15   : > { %637 = vmatpush.msra.mxu3 %v235_v2  ;;  %635 = vmatpush.msra.mxu1 %v235_v2  ;;  %v229_v7 = vld [vmem:[%s741_s22 + $0x60] sm:$0xff]  ;;  %v222_v12 = vld [vmem:[%s741_s22 + $0x28] sm:$0xff]  ;;  %v223_v16 = vld [vmem:[%s741_s22 + $0x30] sm:$0xff] }
  0x16   : > { %304 = vmatpush.msra.mxu0 %v234_v3  ;;  %639 = vmatpush.msra.mxu2 %v234_v3  ;;  %v221_v8 = vld [vmem:[%s741_s22 + $0x20] sm:$0xff]  ;;  %v220_v17 = vld [vmem:[%s741_s22 + $0x18] sm:$0xff] }
  0x17   : > { %640 = vmatpush.msra.mxu3 %v234_v3  ;;  %638 = vmatpush.msra.mxu1 %v234_v3  ;;  %v228_v18 = vld [vmem:[%s741_s22 + $0x58] sm:$0xff]  ;;  %v669_v22 = vld [vmem:[%s819_s2] ss:$0 sm:$0xff] }
  0x18   : > { %305 = vmatpush.msra.mxu0 %v233_v4  ;;  %642 = vmatpush.msra.mxu2 %v233_v4  ;;  %v232_v19 = vld [vmem:[%s741_s22 + $0x78] sm:$0xff]  ;;  %v493_v47 = vld [vmem:[%s820_s3] sm:$0x1] }
  0x19   : > { %643 = vmatpush.msra.mxu3 %v233_v4  ;;  %612 = vmatmul.msk.f32.vlgmr.msra.gmra.mxu0 %vm241_vm0, %v217_v5  ;;  %v224_v20 = vld [vmem:[%s741_s22 + $0x38] sm:$0xff]  ;;  %v517_v52 = vld [vmem:[%s821_s4] sm:$0x1] }
  0x1a   : > { %620 = vmatmul.msk.f32.vlgmr.msra.gmra.mxu2 %vm241_vm0, %v225_v6  ;;  %624 = vmatmul.msk.f32.vlgmr.msra.gmra.mxu3 %vm241_vm0, %v229_v7 }
  0x1b   : > { %641 = vmatpush.msra.mxu1 %v233_v4 }
  0x1c   : > { %616 = vmatmul.msk.f32.vlgmr.msra.gmra.mxu1 %vm241_vm0, %v221_v8 }
  0x21   : > { %613 = vmatmul.msk.f32.gmra.mxu0 %vm241_vm0, %v218_v9 }
  0x22   : > { %621 = vmatmul.msk.f32.gmra.mxu2 %vm241_vm0, %v226_v10  ;;  %625 = vmatmul.msk.f32.gmra.mxu3 %vm241_vm0, %v230_v11 }
  0x24   : > { %617 = vmatmul.msk.f32.gmra.mxu1 %vm241_vm0, %v222_v12 }
  0x29   : > { %614 = vmatmul.msk.f32.gmra.mxu0 %vm241_vm0, %v219_v13 }
  0x2a   : > { %622 = vmatmul.msk.f32.gmra.mxu2 %vm241_vm0, %v227_v14  ;;  %626 = vmatmul.msk.f32.gmra.mxu3 %vm241_vm0, %v231_v15 }
  0x2c   : > { %618 = vmatmul.msk.f32.gmra.mxu1 %vm241_vm0, %v223_v16 }
  0x31   : > { %615 = vmatmul.msk.f32.gmra.mxu0 %vm241_vm0, %v220_v17 }
  0x32   : > { %623 = vmatmul.msk.f32.gmra.mxu2 %vm241_vm0, %v228_v18  ;;  %627 = vmatmul.msk.f32.gmra.mxu3 %vm241_vm0, %v232_v19 }
  0x34   : > { %619 = vmatmul.msk.f32.gmra.mxu1 %vm241_vm0, %v224_v20 }
  0x96   : > { %v307_v21 = vpop.f32.mrf.mxu0 }
  0x97   : > { %v308_v24 = vadd.f32 %v669_v22, %v307_v21 }
  0x99   : > { %v319_v23 = vpop.f32.mrf.mxu1  ;;  %v518_v29 = vmul.f32 %v308_v24, %v308_v24 }
  0x9d   : > { %v331_v25 = vpop.f32.mrf.mxu2  ;;  %v343_v26 = vpop.f32.mrf.mxu3 }
  0x9e   : > { %v310_v27 = vpop.f32.mrf.mxu0 }
  0x9f   : > { %v311_v28 = vadd.f32 %v669_v22, %v310_v27 }
  0xa1   : > { %v494_v30 = vadd.f32 %v311_v28, %v308_v24  ;;  %v519_v31 = vmul.f32 %v311_v28, %v311_v28  ;;  %v322_v32 = vpop.f32.mrf.mxu1 }
  0xa3   : > { %v509_v33 = vrot.slane %v494_v30, 4  ;;  %v534_v34 = vadd.f32 %v519_v31, %v518_v29 }
  0xa5   : > { %v510_v35 = vadd.f32 %v509_v33, %v494_v30  ;;  %v549_v36 = vrot.slane %v534_v34, 4  ;;  %v334_v37 = vpop.f32.mrf.mxu2  ;;  %v346_v38 = vpop.f32.mrf.mxu3 }
  0xa6   : > { %v313_v39 = vpop.f32.mrf.mxu0 }
  0xa7   : > { %v511_v40 = vrot.slane %v510_v35, 2  ;;  %v550_v41 = vadd.f32 %v549_v36, %v534_v34 }
  0xa9   : > { %v512_v42 = vadd.f32 %v511_v40, %v510_v35  ;;  %v551_v43 = vrot.slane %v550_v41, 2  ;;  %v325_v44 = vpop.f32.mrf.mxu1 }
  0xab   : > { %v513_v45 = vrot.slane %v512_v42, 1  ;;  %v552_v46 = vadd.f32 %v551_v43, %v550_v41 }
  0xad   : > { %v514_v48 = vadd.f32 %v513_v45, %v512_v42  ;;  %v553_v49 = vrot.slane %v552_v46, 1  ;;  %v337_v50 = vpop.f32.mrf.mxu2  ;;  %v349_v51 = vpop.f32.mrf.mxu3 }
  0xae   : > { %v316_v53 = vpop.f32.mrf.mxu0 }
  0xaf   : > { %v515_v54 = vadd.f32 %v514_v48, %v493_v47  ;;  %v554_v55 = vadd.f32 %v553_v49, %v552_v46 }
  0xb1   : > { %516 = vst [vmem:[%s820_s3] sm:$0x1] %v515_v54  ;;  %v555_v56 = vadd.f32 %v554_v55, %v517_v52  ;;  %v328_v57 = vpop.f32.mrf.mxu1 }
  0xb3   : > { %556 = vst [vmem:[%s821_s4] sm:$0x1] %v555_v56 }
  0xb5   : > { %v340_v58 = vpop.f32.mrf.mxu2  ;;  %v352_v59 = vpop.f32.mrf.mxu3 }
  0xb6 PF: > { %s15_s17 = sadd.s32 1, %s692_s17   ;;  %s822_s15 = smov %s688_s16 }
  0xb7   : > { %p12_p6 = scmp.ge.s32.totalorder %s15_s17, 4   ;;  %s823_s16 = smov %s825_s18 }
  0xb9   :  { %14 = sbr.rel (!%p12_p6) target bundleno = 2 (0x2), region = 78 }

</bundles_post_ra>
